<compile_context>
chip_gen: v6e
topology: v6e:2x2x1
jax: 0.10.0
libtpu: 0.0.40
codegen_flags: <defaults>
</compile_context>

<pallas_src>
import math

import jax
import jax.numpy as jnp
from jax import lax
from jax.experimental import pallas as pl
from jax.experimental.pallas import tpu as pltpu


def _attention_splitter_kernel(
    x_ref,                 # (Bt, S, D_in)
    wf_ref, bf_ref,        # (D_in, 4H), (1, 4H)   fused input_proj+[k|v|qh*s|qo*s]
    wo_ref, bo_ref,        # (H, D_in), (1, D_in)  output_proj
    out_h_ref,             # (Bt, S, D_in)         human output
    out_o_ref,             # (Bt, S, D_in)         object output
):
    bt, S, D_in = x_ref.shape
    H4 = wf_ref.shape[1]
    H = H4 // 4

    # Single fused projection: (Bt*S, D_in) @ (D_in, 4H) + bias.
    x2 = x_ref[...].reshape(bt * S, D_in)
    kvqq = jnp.dot(x2, wf_ref[...],
                   preferred_element_type=jnp.float32) + bf_ref[...]
    kvqq = kvqq.reshape(bt, S, H4)

    k = kvqq[..., 0 * H:1 * H]                               # (Bt, S, H)
    v = kvqq[..., 1 * H:2 * H]                               # (Bt, S, H)
    # Human / object queries stacked on the row axis: rows [0:S]=human,
    # [S:2S]=object. 1/sqrt(H) already folded into the query weights/biases.
    q = jnp.concatenate(
        [kvqq[..., 2 * H:3 * H], kvqq[..., 3 * H:4 * H]], axis=1)   # (Bt, 2S, H)

    # Batched scores = q @ k^T over the whole batch block, no transpose
    # materialized.
    scores = lax.dot_general(
        q, k, dimension_numbers=(((2,), (2,)), ((0,), (0,))),
        preferred_element_type=jnp.float32)                  # (Bt, 2S, S)
    scores = scores - jnp.max(scores, axis=-1, keepdims=True)
    exps = jnp.exp(scores)
    denom = jnp.sum(exps, axis=-1, keepdims=True)
    r = pl.reciprocal(denom, approx=True)                    # EUP slot (cheap)
    r = r * (2.0 - denom * r)                                # Newton step: exact-ish
    probs = exps * r

    ctx = lax.dot_general(
        probs, v, dimension_numbers=(((2,), (1,)), ((0,), (0,))),
        preferred_element_type=jnp.float32)                  # (Bt, 2S, H)

    # One output projection over all (human + object) rows of the block.
    out = jnp.dot(ctx.reshape(bt * 2 * S, H), wo_ref[...],
                  preferred_element_type=jnp.float32) + bo_ref[...]
    out = out.reshape(bt, 2 * S, D_in)

    out_h_ref[...] = out[:, :S, :].astype(out_h_ref.dtype)
    out_o_ref[...] = out[:, S:, :].astype(out_o_ref.dtype)


def _pick_batch_block(B, S, D_in, H):
    """Batch-rows per grid step.

    Single-TC chips (v5e/v6e): one grid step (bt = B) — the grid is a serial
    loop and each extra step is ~0.35 us of fixed overhead. Dual-TC v7x:
    exactly two 'parallel' steps so both TensorCores are used. The block is
    then VMEM-gated so scaled-up S/D_in don't OOM the scoped limit.
    """
    dual_tc = False
    try:
        kind = jax.devices()[0].device_kind.lower()
        dual_tc = ("v7" in kind) or ("tpu7" in kind)
    except Exception:
        pass

    if dual_tc and B % 2 == 0:
        bt = B // 2
    else:
        bt = B

    def vmem_bytes(b):
        x_blk = b * S * D_in * 4
        out_blk = 2 * b * S * D_in * 4
        weights = (D_in * 4 * H + 4 * H + H * D_in + D_in) * 4
        return 2 * (x_blk + out_blk) + weights        # x2 for double buffering

    limit = 16 * 1024 * 1024                          # conservative scoped budget
    while bt > 1 and bt % 2 == 0 and vmem_bytes(bt) > limit:
        bt //= 2
    return bt


def attention_splitter(x, params):
    """x: (B, S, D_in) float32. Returns (human_output, object_output)."""
    B, S, D_in = x.shape
    H = params["wk"].shape[1]
    bt = _pick_batch_block(B, S, D_in, H)

    scale = 1.0 / math.sqrt(float(H))
    # Fuse K/V/Qh/Qo into one (H, 4H) weight with the attention scale folded
    # into the query columns, then fold the input projection into it.
    w_kvqq = jnp.concatenate(
        [params["wk"], params["wv"],
         params["wqh"] * scale, params["wqo"] * scale], axis=1)      # (H, 4H)
    b_kvqq = jnp.concatenate(
        [params["bk"], params["bv"],
         params["bqh"] * scale, params["bqo"] * scale], axis=1)      # (1, 4H)
    w_fused = params["wp"] @ w_kvqq                                  # (D_in, 4H)
    b_fused = params["bp"] @ w_kvqq + b_kvqq                         # (1, 4H)

    def w_spec(shape):
        return pl.BlockSpec(shape, lambda b: (0,) * len(shape))

    in_specs = [
        pl.BlockSpec((bt, S, D_in), lambda b: (b, 0, 0)),            # x
        w_spec((D_in, 4 * H)), w_spec((1, 4 * H)),                   # fused proj
        w_spec((H, D_in)), w_spec((1, D_in)),                        # output_proj
    ]
    out_specs = [
        pl.BlockSpec((bt, S, D_in), lambda b: (b, 0, 0)),            # human
        pl.BlockSpec((bt, S, D_in), lambda b: (b, 0, 0)),            # object
    ]
    out_shape = (jax.ShapeDtypeStruct((B, S, D_in), jnp.float32),
                 jax.ShapeDtypeStruct((B, S, D_in), jnp.float32))

    fn = pl.pallas_call(
        _attention_splitter_kernel,
        out_shape=out_shape,
        grid_spec=pltpu.PrefetchScalarGridSpec(
            num_scalar_prefetch=0,
            grid=(B // bt,),
            in_specs=in_specs,
            out_specs=out_specs,
        ),
        compiler_params=pltpu.CompilerParams(
            dimension_semantics=("parallel",)),
    )
    human, obj = fn(x, w_fused, b_fused, params["wo"], params["bo"])
    return human, obj


def _xavier_uniform(key, fan_in, fan_out, gain=0.1):
    bound = gain * math.sqrt(6.0 / (fan_in + fan_out))
    return jax.random.uniform(key, (fan_in, fan_out), jnp.float32, -bound, bound)


def init_params(key, input_dim, hidden_dim):
    keys = jax.random.split(key, 6)
    return {
        "wp": _xavier_uniform(keys[0], input_dim, hidden_dim),
        "bp": jnp.zeros((1, hidden_dim), jnp.float32),
        "wqh": _xavier_uniform(keys[1], hidden_dim, hidden_dim),
        "bqh": jnp.zeros((1, hidden_dim), jnp.float32),
        "wqo": _xavier_uniform(keys[2], hidden_dim, hidden_dim),
        "bqo": jnp.zeros((1, hidden_dim), jnp.float32),
        "wk": _xavier_uniform(keys[3], hidden_dim, hidden_dim),
        "bk": jnp.zeros((1, hidden_dim), jnp.float32),
        "wv": _xavier_uniform(keys[4], hidden_dim, hidden_dim),
        "bv": jnp.zeros((1, hidden_dim), jnp.float32),
        "wo": _xavier_uniform(keys[5], hidden_dim, input_dim),
        "bo": jnp.zeros((1, input_dim), jnp.float32),
    }


def reference_forward(x, p):
    """Pure-JAX reference reproducing the PyTorch forward."""
    x_proj = x @ p["wp"] + p["bp"][0]
    k = x_proj @ p["wk"] + p["bk"][0]
    v = x_proj @ p["wv"] + p["bv"][0]
    qh = x_proj @ p["wqh"] + p["bqh"][0]
    qo = x_proj @ p["wqo"] + p["bqo"][0]
    scale = 1.0 / math.sqrt(k.shape[-1])
    ah = jax.nn.softmax(jnp.einsum("bqd,bkd->bqk", qh, k) * scale, axis=-1)
    ao = jax.nn.softmax(jnp.einsum("bqd,bkd->bqk", qo, k) * scale, axis=-1)
    human = jnp.einsum("bqk,bkd->bqd", ah, v) @ p["wo"] + p["bo"][0]
    obj = jnp.einsum("bqk,bkd->bqd", ao, v) @ p["wo"] + p["bo"][0]
    return human, obj


if __name__ == "__main__":
    B, S = 2, 8
    input_dim, hidden_dim = 64, 32

    key = jax.random.PRNGKey(0)
    k_x, k_p = jax.random.split(key)
    x = jax.random.normal(k_x, (B, S, input_dim), jnp.float32)
    params = init_params(k_p, input_dim, hidden_dim)

    human_out, object_out = attention_splitter(x, params)
    jax.block_until_ready((human_out, object_out))

    ref_h, ref_o = reference_forward(x, params)
    assert jnp.allclose(human_out, ref_h, atol=1e-5, rtol=1e-5)
    assert jnp.allclose(object_out, ref_o, atol=1e-5, rtol=1e-5)

    print("KERNEL_OK")
</pallas_src>

<mosaic_0001>
module attributes {stable_mosaic.version = 11 : i64} {
  func.func @_attention_splitter_kernel(%arg0: i32, %arg1: memref<2x8x64xf32, #tpu.memory_space<vmem>>, %arg2: memref<64x128xf32, #tpu.memory_space<vmem>>, %arg3: memref<1x128xf32, #tpu.memory_space<vmem>>, %arg4: memref<32x64xf32, #tpu.memory_space<vmem>>, %arg5: memref<1x64xf32, #tpu.memory_space<vmem>>, %arg6: memref<2x8x64xf32, #tpu.memory_space<vmem>>, %arg7: memref<2x8x64xf32, #tpu.memory_space<vmem>>) attributes {dimension_semantics = [#tpu.dimension_semantics<parallel>], iteration_bounds = array<i64: 1>, scalar_prefetch = 0 : i64, scratch_operands = 0 : i64, tpu.core_type = #tpu.core_type<tc>, window_params = [{transform_indices = @transform_0, window_bounds = array<i64: 2, 8, 64>}, {pipeline_mode = #tpu.pipeline_mode<synchronous>, transform_indices = @transform_1, window_bounds = array<i64: 64, 128>}, {pipeline_mode = #tpu.pipeline_mode<synchronous>, transform_indices = @transform_2, window_bounds = array<i64: 1, 128>}, {pipeline_mode = #tpu.pipeline_mode<synchronous>, transform_indices = @transform_3, window_bounds = array<i64: 32, 64>}, {pipeline_mode = #tpu.pipeline_mode<synchronous>, transform_indices = @transform_4, window_bounds = array<i64: 1, 64>}, {transform_indices = @transform_5, window_bounds = array<i64: 2, 8, 64>}, {transform_indices = @transform_6, window_bounds = array<i64: 2, 8, 64>}]} {
    %c0 = arith.constant 0 : index
    %c0_0 = arith.constant 0 : index
    %c0_1 = arith.constant 0 : index
    %0 = vector.load %arg1[%c0, %c0_0, %c0_1] : memref<2x8x64xf32, #tpu.memory_space<vmem>>, vector<2x8x64xf32>
    %1 = vector.shape_cast %0 : vector<2x8x64xf32> to vector<16x64xf32>
    %c0_2 = arith.constant 0 : index
    %c0_3 = arith.constant 0 : index
    %2 = vector.load %arg2[%c0_2, %c0_3] : memref<64x128xf32, #tpu.memory_space<vmem>>, vector<64x128xf32>
    %cst = arith.constant dense<0.000000e+00> : vector<16x128xf32>
    %3 = tpu.matmul %1, %2, %cst {dimension_numbers = #tpu.dot_dimension_numbers<[1], [0], [0], [1], [0, 0, 1, 1], [], []>} : vector<16x64xf32>, vector<64x128xf32>, vector<16x128xf32> -> vector<16x128xf32>
    %c0_4 = arith.constant 0 : index
    %c0_5 = arith.constant 0 : index
    %4 = vector.load %arg3[%c0_4, %c0_5] : memref<1x128xf32, #tpu.memory_space<vmem>>, vector<1x128xf32>
    %5 = vector.broadcast %4 : vector<1x128xf32> to vector<16x128xf32>
    %6 = arith.addf %3, %5 : vector<16x128xf32>
    %7 = vector.shape_cast %6 : vector<16x128xf32> to vector<2x8x128xf32>
    %8 = vector.extract_strided_slice %7 {offsets = [0, 0, 0], sizes = [2, 8, 32], strides = [1, 1, 1]} : vector<2x8x128xf32> to vector<2x8x32xf32>
    %9 = vector.extract_strided_slice %7 {offsets = [0, 0, 32], sizes = [2, 8, 32], strides = [1, 1, 1]} : vector<2x8x128xf32> to vector<2x8x32xf32>
    %10 = vector.extract_strided_slice %7 {offsets = [0, 0, 64], sizes = [2, 8, 32], strides = [1, 1, 1]} : vector<2x8x128xf32> to vector<2x8x32xf32>
    %11 = vector.extract_strided_slice %7 {offsets = [0, 0, 96], sizes = [2, 8, 32], strides = [1, 1, 1]} : vector<2x8x128xf32> to vector<2x8x32xf32>
    %12 = tpu.concatenate %10, %11 in 1 : vector<2x8x32xf32>, vector<2x8x32xf32> -> vector<2x16x32xf32>
    %cst_6 = arith.constant dense<0.000000e+00> : vector<2x16x8xf32>
    %13 = tpu.matmul %12, %8, %cst_6 {dimension_numbers = #tpu.dot_dimension_numbers<[2], [2], [1], [1], [0, 0, 0, 1, 1, 1], [0], [0]>} : vector<2x16x32xf32>, vector<2x8x32xf32>, vector<2x16x8xf32> -> vector<2x16x8xf32>
    %cst_7 = arith.constant dense<0xFF800000> : vector<2x16xf32>
    %14 = vector.multi_reduction <maximumf>, %13, %cst_7 [2] : vector<2x16x8xf32> to vector<2x16xf32>
    %15 = vector.shape_cast %14 : vector<2x16xf32> to vector<2x16x1xf32>
    %16 = vector.broadcast %15 : vector<2x16x1xf32> to vector<2x16x8xf32>
    %17 = arith.subf %13, %16 : vector<2x16x8xf32>
    %18 = math.exp %17 : vector<2x16x8xf32>
    %cst_8 = arith.constant dense<0.000000e+00> : vector<2x16xf32>
    %19 = vector.multi_reduction <add>, %18, %cst_8 [2] : vector<2x16x8xf32> to vector<2x16xf32>
    %20 = vector.shape_cast %19 : vector<2x16xf32> to vector<2x16x1xf32>
    %21 = tpu.reciprocal %20 {approx = true} : vector<2x16x1xf32> -> vector<2x16x1xf32>
    %22 = arith.mulf %20, %21 : vector<2x16x1xf32>
    %cst_9 = arith.constant 2.000000e+00 : f32
    %23 = vector.broadcast %cst_9 : f32 to vector<2x16x1xf32>
    %24 = arith.subf %23, %22 : vector<2x16x1xf32>
    %25 = arith.mulf %21, %24 : vector<2x16x1xf32>
    %26 = vector.broadcast %25 : vector<2x16x1xf32> to vector<2x16x8xf32>
    %27 = arith.mulf %18, %26 : vector<2x16x8xf32>
    %cst_10 = arith.constant dense<0.000000e+00> : vector<2x16x32xf32>
    %28 = tpu.matmul %27, %9, %cst_10 {dimension_numbers = #tpu.dot_dimension_numbers<[2], [1], [1], [2], [0, 0, 0, 1, 1, 2], [0], [0]>} : vector<2x16x8xf32>, vector<2x8x32xf32>, vector<2x16x32xf32> -> vector<2x16x32xf32>
    %29 = vector.shape_cast %28 : vector<2x16x32xf32> to vector<32x32xf32>
    %c0_11 = arith.constant 0 : index
    %c0_12 = arith.constant 0 : index
    %30 = vector.load %arg4[%c0_11, %c0_12] : memref<32x64xf32, #tpu.memory_space<vmem>>, vector<32x64xf32>
    %cst_13 = arith.constant dense<0.000000e+00> : vector<32x64xf32>
    %31 = tpu.matmul %29, %30, %cst_13 {dimension_numbers = #tpu.dot_dimension_numbers<[1], [0], [0], [1], [0, 0, 1, 1], [], []>} : vector<32x32xf32>, vector<32x64xf32>, vector<32x64xf32> -> vector<32x64xf32>
    %c0_14 = arith.constant 0 : index
    %c0_15 = arith.constant 0 : index
    %32 = vector.load %arg5[%c0_14, %c0_15] : memref<1x64xf32, #tpu.memory_space<vmem>>, vector<1x64xf32>
    %33 = vector.broadcast %32 : vector<1x64xf32> to vector<32x64xf32>
    %34 = arith.addf %31, %33 : vector<32x64xf32>
    %35 = vector.shape_cast %34 : vector<32x64xf32> to vector<2x16x64xf32>
    %36 = vector.extract_strided_slice %35 {offsets = [0, 0, 0], sizes = [2, 8, 64], strides = [1, 1, 1]} : vector<2x16x64xf32> to vector<2x8x64xf32>
    %c0_16 = arith.constant 0 : index
    %c0_17 = arith.constant 0 : index
    %c0_18 = arith.constant 0 : index
    %37 = vector.load %arg6[%c0_16, %c0_17, %c0_18] : memref<2x8x64xf32, #tpu.memory_space<vmem>>, vector<2x8x64xf32>
    tpu.vector_store %arg6[%c0_16, %c0_17, %c0_18], %36 {strides = array<i32>} : memref<2x8x64xf32, #tpu.memory_space<vmem>>, vector<2x8x64xf32>,
    %38 = vector.extract_strided_slice %35 {offsets = [0, 8, 0], sizes = [2, 8, 64], strides = [1, 1, 1]} : vector<2x16x64xf32> to vector<2x8x64xf32>
    %c0_19 = arith.constant 0 : index
    %c0_20 = arith.constant 0 : index
    %c0_21 = arith.constant 0 : index
    %39 = vector.load %arg7[%c0_19, %c0_20, %c0_21] : memref<2x8x64xf32, #tpu.memory_space<vmem>>, vector<2x8x64xf32>
    tpu.vector_store %arg7[%c0_19, %c0_20, %c0_21], %38 {strides = array<i32>} : memref<2x8x64xf32, #tpu.memory_space<vmem>>, vector<2x8x64xf32>,
    return
  }
  func.func @transform_0(%arg0: i32) -> (i32, i32, i32) {
    %c0_i32 = arith.constant 0 : i32
    %c0_i32_0 = arith.constant 0 : i32
    %c0_i32_1 = arith.constant 0 : i32
    return %arg0, %c0_i32, %c0_i32_0 : i32, i32, i32
  }
  func.func @transform_1(%arg0: i32) -> (i32, i32) {
    %c0_i32 = arith.constant 0 : i32
    %c0_i32_0 = arith.constant 0 : i32
    %c0_i32_1 = arith.constant 0 : i32
    return %c0_i32, %c0_i32_0 : i32, i32
  }
  func.func @transform_2(%arg0: i32) -> (i32, i32) {
    %c0_i32 = arith.constant 0 : i32
    %c0_i32_0 = arith.constant 0 : i32
    %c0_i32_1 = arith.constant 0 : i32
    return %c0_i32, %c0_i32_0 : i32, i32
  }
  func.func @transform_3(%arg0: i32) -> (i32, i32) {
    %c0_i32 = arith.constant 0 : i32
    %c0_i32_0 = arith.constant 0 : i32
    %c0_i32_1 = arith.constant 0 : i32
    return %c0_i32, %c0_i32_0 : i32, i32
  }
  func.func @transform_4(%arg0: i32) -> (i32, i32) {
    %c0_i32 = arith.constant 0 : i32
    %c0_i32_0 = arith.constant 0 : i32
    %c0_i32_1 = arith.constant 0 : i32
    return %c0_i32, %c0_i32_0 : i32, i32
  }
  func.func @transform_5(%arg0: i32) -> (i32, i32, i32) {
    %c0_i32 = arith.constant 0 : i32
    %c0_i32_0 = arith.constant 0 : i32
    %c0_i32_1 = arith.constant 0 : i32
    return %arg0, %c0_i32, %c0_i32_0 : i32, i32, i32
  }
  func.func @transform_6(%arg0: i32) -> (i32, i32, i32) {
    %c0_i32 = arith.constant 0 : i32
    %c0_i32_0 = arith.constant 0 : i32
    %c0_i32_1 = arith.constant 0 : i32
    return %arg0, %c0_i32, %c0_i32_0 : i32, i32, i32
  }
}

</mosaic_0001>

<bundles_post_ra>
// kernel: tpu_custom_call.1
= control target key start
LH: loop header
LB: loop body
LE: loop exit
PB: predicated region body
PF: predicated region fallthrough
CT: control target
= control target key end

     0   :  { %12 = vsyncpa [#allocation3], 0  ;;  %s1065_s0 = inlined_call_operand.hbm [shape: f32[2,8,64], index: 0, kind: input, shape index: {}]   ;;  %s1066_s1 = inlined_call_operand.hbm [shape: f32[64,128], index: 1, kind: input, shape index: {}]   ;;  %s1067_s2 = inlined_call_operand.vmem [shape: f32[1,128], index: 2, kind: input, shape index: {}]   ;;  %s1068_s3 = inlined_call_operand.hbm [shape: f32[32,64], index: 3, kind: input, shape index: {}]   ;;  %s1069_s4 = inlined_call_operand.vmem [shape: f32[1,64], index: 4, kind: input, shape index: {}]   ;;  %s1070_s5 = inlined_call_operand.hbm [shape: f32[2,8,64], index: 5, kind: output, shape index: {0}]   ;;  %s1071_s6 = inlined_call_operand.hbm [shape: f32[2,8,64], index: 6, kind: output, shape index: {1}]  }
   0x1   :  { %13 = vsyncpa [#allocation6], 0 }
   0x2   :  { %14 = vsyncpa [#allocation4], 0 }
   0x3   :  { %15 = vsyncpa [#allocation10], 0  ;;  %s950_s21 = smov [#allocation5]   ;;  %s951_s23 = smov [#allocation2]  }
   0x4   :  { %s33_s22 = sshll.u32 %s950_s21, 4  ;;  %s21_s24 = sshll.u32 %s951_s23, 4  ;;  %s34_s22 = int_to_ptr.vmem [resolvable:$true] %s33_s22  ;;  %s22_s24 = int_to_ptr.vmem [resolvable:$true] %s21_s24 }
   0x5   :  { %s850_s25 = scalar_lea.vmem %s34_s22, 1024  ;;  %p855_p1 = scmp.lt.s32.totalorder %s34_s22, %s34_s22 }
   0x6   :  { %p851_p0 = scmp.ne.s32.totalorder %s34_s22, %s850_s25  ;;  %p856_p2 = scmp.lt.s32.totalorder %s850_s25, %s850_s25 }
   0x8   :  { %p857_p3 = por %p856_p2, %p855_p1 }
   0xa   :  { %p858_p4 = pnand %p857_p3, %p851_p0 }
   0xc   :  { %861 = shalt.err (!%p858_p4)
}
   0xd   :  { %s952_s26 = smov 128   ;;  %s953_s27 = smov 8  }
   0xe   :  { %39 = dma.hbm_to_vmem [thread:$0]  %s1066_s1, 1024, %s34_s22, [#allocation6], %s952_s26, %s952_s26, %s953_s27  }
   0xf   :  { %s870_s30 = scalar_lea.vmem %s22_s24, 256  ;;  %p875_p6 = scmp.lt.s32.totalorder %s22_s24, %s22_s24 }
  0x10   :  { %p871_p5 = scmp.ne.s32.totalorder %s22_s24, %s870_s30  ;;  %p876_p7 = scmp.lt.s32.totalorder %s870_s30, %s870_s30 }
  0x12   :  { %p877_p8 = por %p876_p7, %p875_p6 }
  0x14   :  { %p878_p9 = pnand %p877_p8, %p871_p5 }
  0x16   :  { %881 = shalt.err (!%p878_p9)
}
  0x17   :  { %27 = dma.hbm_to_vmem [thread:$0]  %s1065_s0, 256, %s22_s24, [#allocation3], %s952_s26, %s952_s26, %s953_s27  }
  0x18   :  { %s954_s9 = smov [#allocation7]  }
  0x19   :  { %s47_s10 = sshll.u32 %s954_s9, 4  ;;  %s48_s10 = int_to_ptr.vmem [resolvable:$true] %s47_s10 }
  0x1a   :  { %s890_s11 = scalar_lea.vmem %s48_s10, 512  ;;  %p895_p11 = scmp.lt.s32.totalorder %s48_s10, %s48_s10 }
  0x1b   :  { %p891_p10 = scmp.ne.s32.totalorder %s48_s10, %s890_s11  ;;  %p896_p12 = scmp.lt.s32.totalorder %s890_s11, %s890_s11 }
  0x1d   :  { %p897_p13 = por %p896_p12, %p895_p11 }
  0x1f   :  { %p898_p0 = pnand %p897_p13, %p891_p10 }
  0x21   :  { %901 = shalt.err (!%p898_p0)
}
  0x22   :  { %53 = dma.hbm_to_vmem [thread:$0]  %s1068_s3, 512, %s48_s10, [#allocation6], %s952_s26, %s952_s26, %s953_s27  }
  0x23   :  { %942 = dma.done.wait [#allocation3], 256  }
  0x24   :  { %943 = vsyncadd [#allocation3], 4294967040 }
  0x25   :  { %944 = dma.done.wait [#allocation6], 1536  }
  0x26   :  { %945 = vsyncadd [#allocation6], 4294965760  ;;  %v74_v0 = vld [vmem:[#allocation5 + $0x38] sm:$0xff]  ;;  %v73_v1 = vld [vmem:[#allocation5 + $0x30] sm:$0xff]  ;;  %vm82_vm0 = vcmask 523264   ;;  %vm174_vm1 = vcmask 261120  }
  0x27   :  { %756 = vmatprep.subr.mxu0 %v74_v0  ;;  %v72_v2 = vld [vmem:[#allocation5 + $0x28] sm:$0xff]  ;;  %v65_v3 = vld [vmem:[#allocation2] sm:$0xff]  ;;  %v71_v4 = vld [vmem:[#allocation5 + $0x20] sm:$0xff]  ;;  %s955_s13 = smov 64   ;;  %s956_s14 = smov 96   ;;  %vm341_vm2 = vcmask 64512  }
  0x28   :  { %757 = vmatpush3.msra.mxu0 %v74_v0  ;;  %772 = vmatprep.mubr.msk.f32.mxu0 %vm82_vm0, %v65_v3  ;;  %v70_v5 = vld [vmem:[#allocation5 + $0x18] sm:$0xff]  ;;  %v69_v6 = vld [vmem:[#allocation5 + $0x10] sm:$0xff]  ;;  %v68_v7 = vld [vmem:[#allocation5 + $0x8] sm:$0xff]  ;;  %s957_s16 = smov [#allocation9]   ;;  %s958_s18 = smov [#allocation8]  }
  0x29   :  { %758 = vmatprep.subr.mxu0 %v73_v1  ;;  %v67_v8 = vld [vmem:[#allocation5] sm:$0xff]  ;;  %v66_v9 = vld [vmem:[#allocation2 + $0x8] sm:$0xff]  ;;  %v708_v11 = vld [vmem:[%s1067_s2] ss:$0 sm:$0xff]  ;;  %s691_s17 = sshll.u32 %s957_s16, 4  ;;  %s679_s19 = sshll.u32 %s958_s18, 4  ;;  %s692_s17 = int_to_ptr.vmem [resolvable:$true] %s691_s17  ;;  %s680_s19 = int_to_ptr.vmem [resolvable:$true] %s679_s19 }
  0x2a   :  { %759 = vmatpush3.msra.mxu0 %v73_v1  ;;  %v565_v49 = vld [vmem:[#allocation7 + $0x18] sm:$0xff]  ;;  %v564_v50 = vld [vmem:[#allocation7 + $0x10] sm:$0xff]  ;;  %p907_p2 = scmp.lt.s32.totalorder %s692_s17, %s692_s17 }
  0x2b   :  { %760 = vmatprep.subr.mxu0 %v72_v2 }
  0x2c   :  { %761 = vmatpush3.msra.mxu0 %v72_v2 }
  0x2d   :  { %762 = vmatprep.subr.mxu0 %v71_v4 }
  0x2e   :  { %763 = vmatpush3.msra.mxu0 %v71_v4 }
  0x2f   :  { %764 = vmatprep.subr.mxu0 %v70_v5 }
  0x30   :  { %765 = vmatpush3.msra.mxu0 %v70_v5 }
  0x31   :  { %766 = vmatprep.subr.mxu0 %v69_v6 }
  0x32   :  { %767 = vmatpush3.msra.mxu0 %v69_v6 }
  0x33   :  { %768 = vmatprep.subr.mxu0 %v68_v7 }
  0x34   :  { %769 = vmatpush3.msra.mxu0 %v68_v7 }
  0x35   :  { %770 = vmatprep.subr.mxu0 %v67_v8 }
  0x36   :  { %771 = vmatpush3.msra.mxu0 %v67_v8 }
  0x37   :  { %773 = vmatmul.mubr.msk.f32.vlgmr.msra.gmra.mxu0 %vm82_vm0, %v66_v9  ;;  %795 = vmatprep.subr.mxu0 %v565_v49 }
  0x38   :  { %796 = vmatpush3.msra.mxu0 %v565_v49 }
  0x39   :  { %797 = vmatprep.subr.mxu0 %v564_v50 }
  0x3a   :  { %798 = vmatpush3.msra.mxu0 %v564_v50 }
  0xf7   :  { %v774_v10 = vpop.f32.mrf.mxu0 }
  0xf8   :  { %v161_v14 = vadd.f32 %v774_v10, %v708_v11 }
  0xf9   :  { %v155_v12 = vpop.f32.mrf.mxu0 }
  0xfa   :  { %v156_v13 = vadd.f32 %v708_v11, %v155_v12  ;;  %v563_v11 = vld [vmem:[#allocation7 + $0x8] sm:$0xff]  ;;  %v562_v12 = vld [vmem:[#allocation7] sm:$0xff] }
  0xfb   :  { %799 = vmatprep.subr.mxu0 %v563_v11 }
  0xfc   :  { %170 = vrot.lane.b32.xlu1 %v156_v13, %s955_s13  ;;  %166 = vrot.lane.b32.xlu0 %v156_v13, %s956_s14 }
  0xfd   :  { %775 = vmatprep.subr.msk.mxu1 %vm174_vm1, %v156_v13  ;;  %800 = vmatpush3.msra.mxu0 %v563_v11 }
  0xfe   :  { %776 = vmatpush3.xpose.msk.msra.mxu1 %vm174_vm1, %v156_v13  ;;  %801 = vmatprep.subr.mxu0 %v562_v12 }
  0xff   :  { %780 = vmatprep.subr.msk.mxu1 %vm174_vm1, %v161_v14  ;;  %802 = vmatpush3.msra.mxu0 %v562_v12 }
 0x100   :  { %168 = vrot.lane.b32.xlu0 %v161_v14, %s956_s14 }
 0x104   :  { %256 = vrot.lane.b32.xlu0 %v161_v14, %s955_s13 }
 0x16e   :  { %v171_v15 = vpop.permute.xlu1 %170  ;;  %v167_v16 = vpop.permute.xlu0 %166 }
 0x16f   :  { %777 = vmatprep.mubr.msk.f32.mxu1 %vm174_vm1, %v171_v15  ;;  %172 = vrot.lane.b32.xlu1 %v167_v16, %s955_s13 }
 0x172   :  { %v1021_v17 = vpop.permute.xlu0 %168 }
 0x173   :  { %258 = vrot.lane.b32.xlu1 %v1021_v17, %s955_s13 }
 0x176   :  { %v257_v19 = vpop.permute.xlu0 %256 }
 0x1e1   :  { %v173_v18 = vpop.permute.xlu1 %172 }
 0x1e2   :  { %778 = vmatmul.mubr.msk.f32.vlgmr.msra.gmra.mxu1 %vm174_vm1, %v173_v18 }
 0x1e3   :  { %781 = vmatpush3.xpose.msk.msra.mxu1 %vm174_vm1, %v161_v14  ;;  %782 = vmatprep.mubr.msk.f32.mxu1 %vm174_vm1, %v257_v19 }
 0x1e4   :  { %785 = vmatprep.subr.mxu1 %v167_v16 }
 0x1e5   :  { %v259_v20 = vpop.permute.xlu1 %258 }
 0x1e6   :  { %783 = vmatmul.mubr.msk.f32.vlgmr.msra.gmra.mxu1 %vm174_vm1, %v259_v20 }
 0x1e7   :  { %786 = vmatpush3.msra.mxu1 %v167_v16 }
 0x1e8   :  { %790 = vmatprep.subr.mxu1 %v1021_v17 }
 0x2a2   :  { %v779_v21 = vpop.f32.mrf.mxu1 }
 0x2a3   :  { %v345_v22 = vsel %vm341_vm2, %v779_v21, -inf }
 0x2a4   :  { %346 = vmax.xlane.f32.xlu1 %v345_v22  ;;  %v247_v23 = vpop.f32.mrf.mxu1 }
 0x2a5   :  { %v342_v24 = vsel %vm341_vm2, %v247_v23, -inf }
 0x2a6   :  { %343 = vmax.xlane.f32.xlu0 %v342_v24  ;;  %v784_v25 = vpop.f32.mrf.mxu1 }
 0x2a7   :  { %v351_v28 = vsel %vm341_vm2, %v784_v25, -inf }
 0x2a8   :  { %v332_v26 = vpop.f32.mrf.mxu1 }
 0x2a9   :  { %v348_v27 = vsel %vm341_vm2, %v332_v26, -inf }
 0x2aa   :  { %349 = vmax.xlane.f32.xlu0 %v348_v27 }
 0x2ae   :  { %352 = vmax.xlane.f32.xlu0 %v351_v28 }
 0x32d   :  { %v347_v29 = vpop.xlane.xlu1 %346 }
 0x32e   :  { %v355_v30 = vsub.f32 %v779_v21, %v347_v29 }
 0x32f   :  { %v344_v31 = vpop.xlane.xlu0 %343 }
 0x330   :  { %v360_v32 = vmul.f32 1.442695, %v355_v30  ;;  %v354_v33 = vsub.f32 %v247_v23, %v344_v31 }
 0x332   :  { %826 = vpow2.f32 %v360_v32  ;;  %v358_v34 = vmul.f32 1.442695, %v354_v33 }
 0x333   :  { %v350_v35 = vpop.xlane.xlu0 %349 }
 0x334   :  { %828 = vpow2.f32 %v358_v34  ;;  %v356_v36 = vsub.f32 %v332_v26, %v350_v35 }
 0x336   :  { %v362_v37 = vmul.f32 1.442695, %v356_v36 }
 0x337   :  { %v353_v38 = vpop.xlane.xlu0 %352 }
 0x338   :  { %830 = vpow2.f32 %v362_v37  ;;  %v357_v39 = vsub.f32 %v784_v25, %v353_v38 }
 0x33a   :  { %v364_v40 = vmul.f32 1.442695, %v357_v39 }
 0x33c   :  { %832 = vpow2.f32 %v364_v40 }
 0x33f   :  { %v827_v41 = vpop.eup %826 }
 0x340   :  { %v369_v42 = vsel %vm341_vm2, %v827_v41, 0.0 }
 0x341   :  { %v829_v43 = vpop.eup %828  ;;  %370 = vadd.xlane.f32.xlu0 %v369_v42 }
 0x342   :  { %v366_v44 = vsel %vm341_vm2, %v829_v43, 0.0 }
 0x343   :  { %367 = vadd.xlane.f32.xlu1 %v366_v44 }
 0x345   :  { %v831_v45 = vpop.eup %830 }
 0x346   :  { %v372_v46 = vsel %vm341_vm2, %v831_v45, 0.0 }
 0x347   :  { %373 = vadd.xlane.f32.xlu1 %v372_v46 }
 0x349   :  { %v833_v47 = vpop.eup %832 }
 0x34a   :  { %v375_v48 = vsel %vm341_vm2, %v833_v47, 0.0 }
 0x34b   :  { %376 = vadd.xlane.f32.xlu0 %v375_v48 }
 0x3ca   :  { %v371_v51 = vpop.xlane.xlu0 %370 }
 0x3cb   :  { %834 = vrcp.f32 %v371_v51 }
 0x3cc   :  { %v368_v52 = vpop.xlane.xlu1 %367 }
 0x3cd   :  { %836 = vrcp.f32 %v368_v52 }
 0x3d0   :  { %v374_v53 = vpop.xlane.xlu1 %373 }
 0x3d1   :  { %838 = vrcp.f32 %v374_v53 }
 0x3d4   :  { %v377_v54 = vpop.xlane.xlu0 %376 }
 0x3d5   :  { %840 = vrcp.f32 %v377_v54 }
 0x3d8   :  { %v835_v55 = vpop.eup %834 }
 0x3d9   :  { %v383_v56 = vmul.f32 %v835_v55, %v371_v51 }
 0x3da   :  { %v837_v57 = vpop.eup %836 }
 0x3db   :  { %v387_v58 = vsub.f32 2.0, %v383_v56  ;;  %v382_v59 = vmul.f32 %v837_v57, %v368_v52 }
 0x3dd   :  { %v386_v60 = vsub.f32 2.0, %v382_v59  ;;  %v391_v62 = vmul.f32 %v835_v55, %v387_v58 }
 0x3de   :  { %v839_v61 = vpop.eup %838 }
 0x3df   :  { %v390_v63 = vmul.f32 %v837_v57, %v386_v60  ;;  %v384_v0 = vmul.f32 %v839_v61, %v374_v53  ;;  %v395_v4 = vmul.f32 %v827_v41, %v391_v62 }
 0x3e1   :  { %v394_v1 = vmul.f32 %v829_v43, %v390_v63  ;;  %v388_v2 = vsub.f32 2.0, %v384_v0 }
 0x3e2   :  { %v841_v3 = vpop.eup %840 }
 0x3e3   :  { %v392_v5 = vmul.f32 %v839_v61, %v388_v2  ;;  %v385_v6 = vmul.f32 %v841_v3, %v377_v54  ;;  %787 = vmatprep.mubr.msk.f32.mxu1 %vm341_vm2, %v394_v1 }
 0x3e4   :  { %788 = vmatmul.mubr.msk.f32.vlgmr.msra.gmra.mxu1 %vm341_vm2, %v395_v4 }
 0x3e5   :  { %v396_v7 = vmul.f32 %v831_v45, %v392_v5  ;;  %v389_v8 = vsub.f32 2.0, %v385_v6  ;;  %791 = vmatpush3.msra.mxu1 %v1021_v17  ;;  %v721_v17 = vld [vmem:[%s1069_s4] ss:$0 sm:$0xff]  ;;  %s902_s4 = scalar_lea.vmem %s692_s17, 256 }
 0x3e6   :  { %809 = vmatprep.subr.mxu1 %v565_v49  ;;  %p903_p1 = scmp.ne.s32.totalorder %s692_s17, %s902_s4  ;;  %p908_p3 = scmp.lt.s32.totalorder %s902_s4, %s902_s4 }
 0x3e7   :  { %v393_v9 = vmul.f32 %v841_v3, %v389_v8  ;;  %792 = vmatprep.mubr.msk.f32.mxu1 %vm341_vm2, %v396_v7 }
 0x3e8   :  { %p909_p4 = por %p908_p3, %p907_p2 }
 0x3e9   :  { %v397_v10 = vmul.f32 %v833_v47, %v393_v9 }
 0x3ea   :  { %p910_p5 = pnand %p909_p4, %p903_p1 }
 0x3eb   :  { %793 = vmatmul.mubr.msk.f32.vlgmr.msra.gmra.mxu1 %vm341_vm2, %v397_v10 }
 0x3ec   :  { %813 = vmatpush3.msra.mxu1 %v565_v49 }
 0x3ed   :  { %810 = vmatprep.subr.mxu1 %v564_v50 }
 0x3ee   :  { %814 = vmatpush3.msra.mxu1 %v564_v50 }
 0x3ef   :  { %811 = vmatprep.subr.mxu1 %v563_v11 }
 0x3f0   :  { %815 = vmatpush3.msra.mxu1 %v563_v11 }
 0x3f1   :  { %812 = vmatprep.subr.mxu1 %v562_v12 }
 0x3f2   :  { %816 = vmatpush3.msra.mxu1 %v562_v12 }
 0x4a4   :  { %v789_v13 = vpop.f32.mrf.mxu1 }
 0x4a6   :  { %v471_v14 = vpop.f32.mrf.mxu1 }
 0x4a7   :  { %803 = vmatprep.mubr.msk.f32.mxu0 %vm174_vm1, %v471_v14 }
 0x4a8   :  { %804 = vmatmul.mubr.msk.f32.vlgmr.msra.gmra.mxu0 %vm174_vm1, %v789_v13 }
 0x4ab   :  { %v794_v15 = vpop.f32.mrf.mxu1 }
 0x4ad   :  { %v553_v16 = vpop.f32.mrf.mxu1 }
 0x4ae   :  { %806 = vmatprep.mubr.msk.f32.mxu1 %vm174_vm1, %v553_v16 }
 0x4af   :  { %807 = vmatmul.mubr.msk.f32.vlgmr.msra.gmra.mxu1 %vm174_vm1, %v794_v15 }
 0x568   :  { %v805_v18 = vpop.f32.mrf.mxu0 }
 0x569   :  { %v657_v19 = vadd.f32 %v805_v18, %v721_v17 }
 0x56a   :  { %v651_v20 = vpop.f32.mrf.mxu0 }
 0x56b   :  { %672 = vst.msk [vmem:[#allocation9] sm:$0xff] %vm82_vm0, %v657_v19  ;;  %v652_v21 = vadd.f32 %v721_v17, %v651_v20 }
 0x56d   :  { %670 = vst.msk [vmem:[#allocation8] sm:$0xff] %vm82_vm0, %v652_v21 }
 0x56f   :  { %v808_v22 = vpop.f32.mrf.mxu1 }
 0x570   :  { %v667_v23 = vadd.f32 %v808_v22, %v721_v17 }
 0x571   :  { %v661_v24 = vpop.f32.mrf.mxu1 }
 0x572   :  { %673 = vst.msk [vmem:[#allocation9 + $0x8] sm:$0xff] %vm82_vm0, %v667_v23  ;;  %v662_v25 = vadd.f32 %v721_v17, %v661_v24 }
 0x573   :  { %913 = shalt.err (!%p910_p5)
}
 0x574   :  { %697 = dma.vmem_to_hbm [thread:$0]  %s692_s17, 256, %s1071_s6, [#allocation10], %s952_s26, %s952_s26, %s953_s27   ;;  %671 = vst.msk [vmem:[#allocation8 + $0x8] sm:$0xff] %vm82_vm0, %v662_v25 }
 0x575   :  { %s922_s22 = scalar_lea.vmem %s680_s19, 256  ;;  %p927_p7 = scmp.lt.s32.totalorder %s680_s19, %s680_s19 }
 0x576   :  { %p923_p6 = scmp.ne.s32.totalorder %s680_s19, %s922_s22  ;;  %p928_p8 = scmp.lt.s32.totalorder %s922_s22, %s922_s22 }
 0x578   :  { %p929_p9 = por %p928_p8, %p927_p7 }
 0x57a   :  { %p930_p10 = pnand %p929_p9, %p923_p6 }
 0x57c   :  { %933 = shalt.err (!%p930_p10)
}
 0x57d   :  { %685 = dma.vmem_to_hbm [thread:$0]  %s680_s19, 256, %s1070_s5, [#allocation4], %s952_s26, %s952_s26, %s953_s27  }
 0x57e   :  { %946 = dma.done.wait [#allocation4], 256  }
 0x57f   :  { %947 = vsyncadd [#allocation4], 4294967040 }
 0x580   :  { %948 = dma.done.wait [#allocation10], 256  }
 0x581   :  { %949 = vsyncadd [#allocation10], 4294967040 }
 0x582   :  { %704 = vsyncpa [#allocation3], 1 }
 0x583   :  { %705 = vsyncpa [#allocation6], 1 }
 0x584   :  { %706 = vsyncpa [#allocation4], 1 }
 0x585   :  { %707 = vsyncpa [#allocation10], 1 }

</bundles_post_ra>
